<compile_context>
chip_gen: v6e
topology: v6e:2x2x1
jax: 0.10.0
libtpu: 0.0.40
codegen_flags: <defaults>
</compile_context>

<pallas_src>
import jax
import jax.numpy as jnp
from jax.experimental import pallas as pl
from jax.experimental.pallas import tpu as pltpu


def _round_up(x, m):
    return -(-x // m) * m


# -------------------- fused conv1to3 + GAP + DropoutFC kernel ---------------
def fused_customnet_kernel(x_ref, w_ref, b_ref, o_ref):
    """x_ref : (block_n, H*W) VMEM   flattened input images
       w_ref : (H*W, 4)      VMEM   effective weight (conv*GAP*FC folded)
       b_ref : (1, 4)        VMEM   effective bias
       o_ref : (block_n, 4)  VMEM   logits
    """
    o_ref[...] = (
        jnp.dot(x_ref[...], w_ref[...], preferred_element_type=jnp.float32)
        + b_ref[...]
    ).astype(o_ref.dtype)


def _pick_block_n(n, hw, *, vmem_budget_bytes=16 << 20):
    """Batch-block size, sized against the true padded VMEM footprint of the
    flattened (block_n, H*W) tile (lane dim rounded to 128, sublane-aligned,
    double buffered).  For larger batches it keeps >=2 grid steps so v7x's two
    TensorCores both get work; the extra step costs ~0.35us on 1-TC chips."""
    per_image = _round_up(hw, 128) * 4                  # padded f32 bytes/img
    cap = vmem_budget_bytes // (2 * per_image)          # 2x: double buffering
    cap = max(8, (cap // 8) * 8)                        # (8,128) sublane rule
    cap = min(cap, _round_up(n, 8))                     # never exceed batch
    if n >= 16:                                         # leave >=2 grid steps
        cap = min(cap, _round_up(_round_up(n, 2) // 2, 8))
    return cap


def customnet_forward(x, params, *, block_n=None):
    """x: (N, 1, H, W) float32. params: conv_w (3,1,3,3), conv_b (3,),
    fc_w (4,3) (PyTorch (out, in)), fc_b (4,). Returns (N, 4) logits."""
    n, c, h, w = x.shape
    assert c == 1
    hw = h * w

    if block_n is None:
        block_n = _pick_block_n(n, hw)
    assert block_n % 8 == 0, "block_n must be sublane-aligned (multiple of 8)"

    # --- fold conv1to3 (SAME zero pad) + global-average-pool + fc into one
    #     effective (H*W, 4) weight and (4,) bias.  SAME zero padding <=>
    #     tap (kh=0) never sees the last row, (kh=2) never the first, etc.,
    #     expressed as per-tap row/column masks.
    conv_w = params["conv_w"].reshape(3, 3, 3).astype(jnp.float32)   # (c,kh,kw)
    conv_b = params["conv_b"].astype(jnp.float32)                    # (3,)
    fc_w = params["fc_w"].astype(jnp.float32)                        # (4, 3)
    fc_b = params["fc_b"].astype(jnp.float32)                        # (4,)

    rows = jnp.arange(h)
    cols = jnp.arange(w)
    row_m = jnp.stack([rows < h - 1, jnp.ones((h,), bool), rows > 0]
                      ).astype(jnp.float32)                          # (3, H)
    col_m = jnp.stack([cols < w - 1, jnp.ones((w,), bool), cols > 0]
                      ).astype(jnp.float32)                          # (3, W)
    # per-pixel effective conv weight A[c, r, q] = sum_{kh,kw} w[c,kh,kw]*masks
    a = jnp.einsum("ckl,kr,lq->crq", conv_w, row_m, col_m)           # (3,H,W)
    w_eff = (a.reshape(3, hw).T / float(hw)) @ fc_w.T                # (HW, 4)
    b_eff = (fc_w @ conv_b + fc_b).reshape(1, 4)                     # (1, 4)

    # --- flatten spatial dims (contiguous, free) and pad the batch so the
    #     batch block always tiles it exactly.
    x_flat = x.reshape(n, hw).astype(jnp.float32)
    n_pad = _round_up(n, block_n)
    if n_pad != n:
        x_flat = jnp.pad(x_flat, ((0, n_pad - n), (0, 0)))

    # --- VMEM accounting (padded tiles, double buffering) + compiler limit.
    bn_pad = _round_up(block_n, 8)
    hw_lane = _round_up(hw, 128)
    vmem_needed = (2 * bn_pad * hw_lane * 4          # double-buffered x block
                   + 2 * bn_pad * 128 * 4            # double-buffered out block
                   + 2 * _round_up(hw, 8) * 128 * 4  # w_eff (lane pad 4->128)
                   + 2 * 8 * 128 * 4)                # b_eff
    vmem_limit = int(min(48 << 20, max(4 << 20, 2 * vmem_needed)))

    cost = pl.CostEstimate(
        flops=2 * n_pad * hw * 4 + n_pad * 4,
        transcendentals=0,
        bytes_accessed=n_pad * hw * 4 + hw * 4 * 4 + n_pad * 4 * 4 + 4 * 4,
    )

    out = pl.pallas_call(
        fused_customnet_kernel,
        out_shape=jax.ShapeDtypeStruct((n_pad, 4), jnp.float32),
        grid=(n_pad // block_n,),
        in_specs=[
            pl.BlockSpec((block_n, hw), lambda i: (i, 0)),   # x (streamed)
            pl.BlockSpec((hw, 4), lambda i: (0, 0)),         # W_eff (resident)
            pl.BlockSpec((1, 4), lambda i: (0, 0)),          # b_eff (resident)
        ],
        out_specs=pl.BlockSpec((block_n, 4), lambda i: (i, 0)),
        compiler_params=pltpu.CompilerParams(
            dimension_semantics=("parallel",),
            vmem_limit_bytes=vmem_limit,
        ),
        cost_estimate=cost,
    )(x_flat, w_eff, b_eff)

    return out[:n]


# ---------------------------------- main ------------------------------------
if __name__ == "__main__":
    key = jax.random.PRNGKey(0)

    def make_case(k, n, h, w):
        k_x, k_cw, k_cb, k_fw, k_fb = jax.random.split(k, 5)
        x = jax.random.normal(k_x, (n, 1, h, w), jnp.float32)
        params = {
            "conv_w": 0.1 * jax.random.normal(k_cw, (3, 1, 3, 3), jnp.float32),
            "conv_b": 0.1 * jax.random.normal(k_cb, (3,), jnp.float32),
            "fc_w": 0.1 * jax.random.normal(k_fw, (4, 3), jnp.float32),
            "fc_b": 0.1 * jax.random.normal(k_fb, (4,), jnp.float32),
        }
        return x, params

    def reference(x, params):
        # Pure-JAX reference for the implemented (surrogate-backbone) path:
        # SAME zero-pad 3x3 conv 1->3, global average pool, Linear 3->4.
        feat = jax.lax.conv_general_dilated(
            x, params["conv_w"], window_strides=(1, 1), padding="SAME",
            dimension_numbers=("NCHW", "OIHW", "NCHW"),
        ) + params["conv_b"].reshape(1, 3, 1, 1)
        return jnp.mean(feat, axis=(2, 3)) @ params["fc_w"].T + params["fc_b"]

    k1, k2 = jax.random.split(key)

    # Main case (module implies a single input channel).
    x, params = make_case(k1, 2, 16, 16)
    out = jax.block_until_ready(customnet_forward(x, params))
    assert out.shape == (2, 4)
    assert bool(jnp.allclose(out, reference(x, params), rtol=1e-3, atol=1e-4))

    # Odd spatial dims, H*W not a multiple of 128, batch needing padding
    # (exercises the edge-mask folding and the batch-padding path).
    x2, params2 = make_case(k2, 3, 7, 5)
    out2 = jax.block_until_ready(customnet_forward(x2, params2))
    assert out2.shape == (3, 4)
    assert bool(jnp.allclose(out2, reference(x2, params2), rtol=1e-3, atol=1e-4))

    print("KERNEL_OK")
</pallas_src>

<mosaic_0001>
module attributes {stable_mosaic.version = 11 : i64} {
  func.func @fused_customnet_kernel(%arg0: i32, %arg1: memref<8x256xf32, #tpu.memory_space<vmem>>, %arg2: memref<256x4xf32, #tpu.memory_space<vmem>>, %arg3: memref<1x4xf32, #tpu.memory_space<vmem>>, %arg4: memref<8x4xf32, #tpu.memory_space<vmem>>) attributes {dimension_semantics = [#tpu.dimension_semantics<parallel>], iteration_bounds = array<i64: 1>, scalar_prefetch = 0 : i64, scratch_operands = 0 : i64, tpu.core_type = #tpu.core_type<tc>, window_params = [{transform_indices = @transform_0, window_bounds = array<i64: 8, 256>}, {pipeline_mode = #tpu.pipeline_mode<synchronous>, transform_indices = @transform_1, window_bounds = array<i64: 256, 4>}, {pipeline_mode = #tpu.pipeline_mode<synchronous>, transform_indices = @transform_2, window_bounds = array<i64: 1, 4>}, {transform_indices = @transform_3, window_bounds = array<i64: 8, 4>}]} {
    %c0 = arith.constant 0 : index
    %c0_0 = arith.constant 0 : index
    %0 = vector.load %arg1[%c0, %c0_0] : memref<8x256xf32, #tpu.memory_space<vmem>>, vector<8x256xf32>
    %c0_1 = arith.constant 0 : index
    %c0_2 = arith.constant 0 : index
    %1 = vector.load %arg2[%c0_1, %c0_2] : memref<256x4xf32, #tpu.memory_space<vmem>>, vector<256x4xf32>
    %cst = arith.constant dense<0.000000e+00> : vector<8x4xf32>
    %2 = tpu.matmul %0, %1, %cst {dimension_numbers = #tpu.dot_dimension_numbers<[1], [0], [0], [1], [0, 0, 1, 1], [], []>} : vector<8x256xf32>, vector<256x4xf32>, vector<8x4xf32> -> vector<8x4xf32>
    %c0_3 = arith.constant 0 : index
    %c0_4 = arith.constant 0 : index
    %3 = vector.load %arg3[%c0_3, %c0_4] : memref<1x4xf32, #tpu.memory_space<vmem>>, vector<1x4xf32>
    %4 = vector.broadcast %3 : vector<1x4xf32> to vector<8x4xf32>
    %5 = arith.addf %2, %4 : vector<8x4xf32>
    %c0_5 = arith.constant 0 : index
    %c0_6 = arith.constant 0 : index
    %6 = vector.load %arg4[%c0_5, %c0_6] : memref<8x4xf32, #tpu.memory_space<vmem>>, vector<8x4xf32>
    tpu.vector_store %arg4[%c0_5, %c0_6], %5 {strides = array<i32>} : memref<8x4xf32, #tpu.memory_space<vmem>>, vector<8x4xf32>,
    return
  }
  func.func @transform_0(%arg0: i32) -> (i32, i32) {
    %c0_i32 = arith.constant 0 : i32
    %c0_i32_0 = arith.constant 0 : i32
    return %arg0, %c0_i32 : i32, i32
  }
  func.func @transform_1(%arg0: i32) -> (i32, i32) {
    %c0_i32 = arith.constant 0 : i32
    %c0_i32_0 = arith.constant 0 : i32
    %c0_i32_1 = arith.constant 0 : i32
    return %c0_i32, %c0_i32_0 : i32, i32
  }
  func.func @transform_2(%arg0: i32) -> (i32, i32) {
    %c0_i32 = arith.constant 0 : i32
    %c0_i32_0 = arith.constant 0 : i32
    %c0_i32_1 = arith.constant 0 : i32
    return %c0_i32, %c0_i32_0 : i32, i32
  }
  func.func @transform_3(%arg0: i32) -> (i32, i32) {
    %c0_i32 = arith.constant 0 : i32
    %c0_i32_0 = arith.constant 0 : i32
    return %arg0, %c0_i32 : i32, i32
  }
}

</mosaic_0001>

<bundles_post_ra>
// kernel: tpu_custom_call.1
= control target key start
LH: loop header
LB: loop body
LE: loop exit
PB: predicated region body
PF: predicated region fallthrough
CT: control target
= control target key end

     0   :  { %vm125_vm0 = vcmask 31744   ;;  %s295_s1 = inlined_call_operand.vmem [shape: f32[256,4], index: 1, kind: input, shape index: {}]   ;;  %s296_s0 = inlined_call_operand.vmem [shape: f32[8,256], index: 0, kind: input, shape index: {}]   ;;  %s297_s2 = inlined_call_operand.vmem [shape: f32[1,4], index: 2, kind: input, shape index: {}]   ;;  %s298_s3 = inlined_call_operand.vmem [shape: f32[8,4], index: 3, kind: output, shape index: {}]  }
   0x1   :  { %v47_v0 = vld [vmem:[%s295_s1 + $0xf8] sm:$0xff]  ;;  %v46_v2 = vld [vmem:[%s295_s1 + $0xf0] sm:$0xff]  ;;  %v45_v4 = vld [vmem:[%s295_s1 + $0xe8] sm:$0xff] }
   0x2   :  { %v31_v1 = vld [vmem:[%s295_s1 + $0x78] sm:$0xff]  ;;  %132 = vmatprep.subr.mxu0 %v47_v0  ;;  %v30_v3 = vld [vmem:[%s295_s1 + $0x70] sm:$0xff]  ;;  %v29_v5 = vld [vmem:[%s295_s1 + $0x68] sm:$0xff] }
   0x3   :  { %133 = vmatpush3.msra.mxu0 %v31_v1  ;;  %v44_v6 = vld [vmem:[%s295_s1 + $0xe0] sm:$0xff]  ;;  %v43_v8 = vld [vmem:[%s295_s1 + $0xd8] sm:$0xff]  ;;  %v42_v10 = vld [vmem:[%s295_s1 + $0xd0] sm:$0xff] }
   0x4   :  { %134 = vmatprep.subr.mxu0 %v46_v2  ;;  %v28_v7 = vld [vmem:[%s295_s1 + $0x60] sm:$0xff]  ;;  %v27_v9 = vld [vmem:[%s295_s1 + $0x58] sm:$0xff]  ;;  %v26_v11 = vld [vmem:[%s295_s1 + $0x50] sm:$0xff] }
   0x5   :  { %135 = vmatpush3.msra.mxu0 %v30_v3  ;;  %v41_v12 = vld [vmem:[%s295_s1 + $0xc8] sm:$0xff]  ;;  %v40_v15 = vld [vmem:[%s295_s1 + $0xc0] sm:$0xff]  ;;  %v39_v17 = vld [vmem:[%s295_s1 + $0xb8] sm:$0xff] }
   0x6   :  { %136 = vmatprep.subr.mxu0 %v45_v4  ;;  %v15_v13 = vld [vmem:[%s296_s0 + $0x8] sm:$0xff]  ;;  %v24_v16 = vld [vmem:[%s295_s1 + $0x40] sm:$0xff]  ;;  %v23_v18 = vld [vmem:[%s295_s1 + $0x38] sm:$0xff] }
   0x7   :  { %137 = vmatpush3.msra.mxu0 %v29_v5  ;;  %v25_v14 = vld [vmem:[%s295_s1 + $0x48] sm:$0xff]  ;;  %119 = vmatprep.mubr.f32.mxu0 %v15_v13  ;;  %v38_v19 = vld [vmem:[%s295_s1 + $0xb0] sm:$0xff]  ;;  %v36_v23 = vld [vmem:[%s295_s1 + $0xa0] sm:$0xff] }
   0x8   :  { %138 = vmatprep.subr.mxu0 %v44_v6  ;;  %v22_v20 = vld [vmem:[%s295_s1 + $0x30] sm:$0xff]  ;;  %v37_v21 = vld [vmem:[%s295_s1 + $0xa8] sm:$0xff]  ;;  %v20_v24 = vld [vmem:[%s295_s1 + $0x20] sm:$0xff] }
   0x9   :  { %139 = vmatpush3.msra.mxu0 %v28_v7  ;;  %v21_v22 = vld [vmem:[%s295_s1 + $0x28] sm:$0xff]  ;;  %v35_v25 = vld [vmem:[%s295_s1 + $0x98] sm:$0xff]  ;;  %v34_v27 = vld [vmem:[%s295_s1 + $0x90] sm:$0xff] }
   0xa   :  { %140 = vmatprep.subr.mxu0 %v43_v8  ;;  %v19_v26 = vld [vmem:[%s295_s1 + $0x18] sm:$0xff]  ;;  %v18_v28 = vld [vmem:[%s295_s1 + $0x10] sm:$0xff]  ;;  %v33_v29 = vld [vmem:[%s295_s1 + $0x88] sm:$0xff] }
   0xb   :  { %141 = vmatpush3.msra.mxu0 %v27_v9  ;;  %v17_v30 = vld [vmem:[%s295_s1 + $0x8] sm:$0xff]  ;;  %v32_v31 = vld [vmem:[%s295_s1 + $0x80] sm:$0xff] }
   0xc   :  { %142 = vmatprep.subr.mxu0 %v42_v10  ;;  %v16_v32 = vld [vmem:[%s295_s1] sm:$0xff] }
   0xd   :  { %143 = vmatpush3.msra.mxu0 %v26_v11  ;;  %v14_v33 = vld [vmem:[%s296_s0] sm:$0xff] }
   0xe   :  { %144 = vmatprep.subr.mxu0 %v41_v12  ;;  %v131_v35 = vld [vmem:[%s297_s2] ss:$0 sm:$0xff] }
   0xf   :  { %145 = vmatpush3.msra.mxu0 %v25_v14 }
  0x10   :  { %146 = vmatprep.subr.mxu0 %v40_v15 }
  0x11   :  { %147 = vmatpush3.msra.mxu0 %v24_v16 }
  0x12   :  { %148 = vmatprep.subr.mxu0 %v39_v17 }
  0x13   :  { %149 = vmatpush3.msra.mxu0 %v23_v18 }
  0x14   :  { %150 = vmatprep.subr.mxu0 %v38_v19 }
  0x15   :  { %151 = vmatpush3.msra.mxu0 %v22_v20 }
  0x16   :  { %152 = vmatprep.subr.mxu0 %v37_v21 }
  0x17   :  { %153 = vmatpush3.msra.mxu0 %v21_v22 }
  0x18   :  { %154 = vmatprep.subr.mxu0 %v36_v23 }
  0x19   :  { %155 = vmatpush3.msra.mxu0 %v20_v24 }
  0x1a   :  { %156 = vmatprep.subr.mxu0 %v35_v25 }
  0x1b   :  { %157 = vmatpush3.msra.mxu0 %v19_v26 }
  0x1c   :  { %158 = vmatprep.subr.mxu0 %v34_v27 }
  0x1d   :  { %159 = vmatpush3.msra.mxu0 %v18_v28 }
  0x1e   :  { %160 = vmatprep.subr.mxu0 %v33_v29 }
  0x1f   :  { %161 = vmatpush3.msra.mxu0 %v17_v30 }
  0x20   :  { %162 = vmatprep.subr.mxu0 %v32_v31 }
  0x21   :  { %163 = vmatpush3.msra.mxu0 %v16_v32 }
  0x22   :  { %120 = vmatmul.mubr.f32.vlgmr.msra.gmra.mxu0 %v14_v33 }
  0xe2   :  { %v164_v34 = vpop.f32.mrf.mxu0 }
  0xe4   :  { %v165_v36 = vpop.f32.mrf.mxu0 }
  0xe5   :  { %v166_v37 = vadd.f32 %v165_v36, %v164_v34 }
  0xe7   :  { %v122_v38 = vadd.f32 %v166_v37, %v131_v35 }
  0xe9   :  { %126 = vst.msk [vmem:[%s298_s3] sm:$0xff] %vm125_vm0, %v122_v38 }

</bundles_post_ra>
